<compile_context>
chip_gen: v7x
topology: tpu7x:2x2x1
jax: 0.10.0
libtpu: 0.0.40
codegen_flags: <defaults>
</compile_context>

<pallas_src>
import jax
import jax.numpy as jnp
from jax import lax
from jax.experimental import pallas as pl
from jax.experimental.pallas import tpu as pltpu

PAD_INDEX = 0        # index of '<p>' in the (synthetic) word2vec vocab
_NEG_BIG = -1e30     # "minus infinity" bias for padded vocab columns (finite -> no NaN)


# ----------------------------------------------------------------------------- kernels

def _fm_single_kernel(x_ref, w_ref, b_ref, tgt_ref, out_ref, loss_ref):
    # Whole (padded) vocab in one tile: single MXU pass, loss fused with the logp store.
    logits = jnp.dot(x_ref[...], w_ref[...], preferred_element_type=jnp.float32)
    logits = logits + b_ref[...].astype(jnp.float32)                  # (tm, V) f32

    m = jnp.max(logits, axis=-1, keepdims=True)
    s = jnp.sum(jnp.exp(logits - m), axis=-1, keepdims=True)
    lse = m + jnp.log(s)
    logp = logits - lse                                               # (tm, V)
    out_ref[...] = logp.astype(out_ref.dtype)

    # Gather target log-prob from the logp values already in vregs.
    # NOTE: targets are assumed to be in [0, V) (validate upstream).
    tgt = tgt_ref[...]                                                # (tm, 1) int32
    tm, vt = logp.shape
    col = lax.broadcasted_iota(jnp.int32, (tm, vt), 1)
    picked = jnp.sum(jnp.where(col == tgt, logp, 0.0), axis=-1, keepdims=True)
    valid = (tgt != PAD_INDEX).astype(jnp.float32)
    loss_ref[...] = jnp.full(loss_ref.shape, jnp.sum(-valid * picked), jnp.float32)


def _make_tiled_kernel(nv, tv):
    """V-tiled kernel: k < nv -> online-LSE sweep; k >= nv -> recompute + store logp."""

    def kernel(x_ref, w_ref, b_ref, tgt_ref, out_ref, loss_ref, m_sc, s_sc, p_sc):
        k = pl.program_id(1)
        phase0 = k < nv
        j = jnp.where(phase0, k, k - nv)            # vocab-block index of this step

        @pl.when(k == 0)
        def _():
            m_sc[...] = jnp.full_like(m_sc, -jnp.inf)
            s_sc[...] = jnp.zeros_like(s_sc)
            p_sc[...] = jnp.zeros_like(p_sc)

        logits = jnp.dot(x_ref[...], w_ref[...], preferred_element_type=jnp.float32)
        logits = logits + b_ref[...].astype(jnp.float32)              # (tm, tv) f32
        tm = logits.shape[0]

        @pl.when(phase0)                             # online logsumexp + target-logit gather
        def _():
            tgt = tgt_ref[...]
            col = j * tv + lax.broadcasted_iota(jnp.int32, (tm, tv), 1)
            p_sc[...] = p_sc[...] + jnp.sum(
                jnp.where(col == tgt, logits, 0.0), axis=-1, keepdims=True)
            m_new = jnp.maximum(m_sc[...], jnp.max(logits, axis=-1, keepdims=True))
            s_sc[...] = (s_sc[...] * jnp.exp(m_sc[...] - m_new)
                         + jnp.sum(jnp.exp(logits - m_new), axis=-1, keepdims=True))
            m_sc[...] = m_new

        @pl.when(k >= nv)                            # second V sweep: emit logp tile
        def _():
            lse = m_sc[...] + jnp.log(s_sc[...])
            out_ref[...] = (logits - lse).astype(out_ref.dtype)

        @pl.when(k == 2 * nv - 1)                    # per-token-tile partial loss
        def _():
            lse = m_sc[...] + jnp.log(s_sc[...])
            tgt = tgt_ref[...]
            valid = (tgt != PAD_INDEX).astype(jnp.float32)
            # p_sc holds logit[i, t_i]; loss_i = valid_i * (lse_i - logit[i, t_i]).
            loss_ref[...] = jnp.full(loss_ref.shape,
                                     jnp.sum(valid * (lse - p_sc[...])), jnp.float32)

    return kernel


# ----------------------------------------------------------------------------- wrapper

def _round_up(x, m):
    return -(-x // m) * m


def _block_spec(shape, index_map, *, buffered=None):
    """BlockSpec with optional single/multi-buffering; falls back if unsupported."""
    if buffered is not None and hasattr(pl, "Buffered"):
        try:
            return pl.BlockSpec(shape, index_map, pipeline_mode=pl.Buffered(buffered))
        except TypeError:
            pass
    return pl.BlockSpec(shape, index_map)


def _vmem_budget_bytes():
    """Per-core VMEM budget: drives both the tile heuristic and vmem_limit_bytes."""
    try:
        cap = int(getattr(pltpu.get_tpu_info(), "vmem_capacity_bytes", 0) or 0)
        if cap > 0:
            # v5e/v6e (128 MiB) -> ~100 MiB usable; v7x (64 MiB) -> ~56 MiB.
            return max(24 << 20, min(cap - (8 << 20), 100 << 20))
    except Exception:
        pass
    return 48 << 20  # conservative fallback, safe on every generation


def _choose_tiles(n, h, v, x_bytes, w_bytes, b_bytes, out_bytes, budget):
    sub = 16 if 2 in (x_bytes, w_bytes, out_bytes) else 8   # bf16 sublane packing unit
    v128 = _round_up(v, 128)
    usable = int(budget * 0.85)
    # Token tile: target the 256-wide MXU M dimension (v6e/v7x); never below the
    # sublane multiple, never (much) bigger than N.
    tm = min(256, _round_up(n, sub))
    tv = 128
    while True:
        fixed = (2 * tm * h * x_bytes        # double-buffered x tile
                 + 2 * tm * 4                # targets tile
                 + 2 * 128 * 4               # loss tile
                 + 4 * tm * 4                # online-LSE scratch
                 + (2 << 20))                # compiler-internal slack
        per_tv = (2 * h * w_bytes            # double-buffered W tile (per vocab column)
                  + 2 * b_bytes
                  + 2 * tm * out_bytes       # double-buffered logp tile
                  + 3 * tm * 4)              # f32 logits / exp temporaries
        tv = (usable - fixed) // per_tv // 128 * 128
        if tv >= 128 or tm <= sub:
            break
        tm = max(sub, (tm // 2) // sub * sub)
    tv = int(max(128, min(tv, v128, 8192)))
    return tm, tv, v128


def full_model_forward(inputs, weight, bias, targets, *,
                       out_dtype=jnp.float32, tile_override=None):
    """FullModel.forward: returns (loss[1], log_probs[N, V]).

    inputs : (N, H) features (bf16 or f32 -- fed to the MXU as-is, f32 accumulate)
    weight : (H, V), bias: (V,)
    targets: (N,) int class indices in [0, V); PAD_INDEX entries ignored in the loss.
    out_dtype: dtype of returned log-probs (bf16 halves the dominant HBM writeback).
    """
    n, h = inputs.shape
    v = weight.shape[1]
    x_bytes = inputs.dtype.itemsize
    w_bytes = weight.dtype.itemsize
    b_bytes = bias.dtype.itemsize
    out_bytes = jnp.dtype(out_dtype).itemsize

    budget = _vmem_budget_bytes()
    if tile_override is not None:
        tm, tv = tile_override
        v128 = _round_up(v, 128)
    else:
        tm, tv, v128 = _choose_tiles(n, h, v, x_bytes, w_bytes, b_bytes,
                                     out_bytes, budget)

    single = tv >= v128
    if single:
        tv = v_pad = v128
        nv = 1
    else:
        v_pad = _round_up(v, tv)
        nv = v_pad // tv

    n_pad = _round_up(n, tm)
    nm = n_pad // tm

    # Pad tokens: zero features + PAD_INDEX target -> zero loss contribution.
    x = inputs
    tgt = targets.astype(jnp.int32)
    if n_pad != n:
        x = jnp.pad(x, ((0, n_pad - n), (0, 0)))
        tgt = jnp.pad(tgt, (0, n_pad - n), constant_values=PAD_INDEX)
    tgt2 = tgt.reshape(n_pad, 1)

    # Pad vocab: zero weights + ~-inf bias -> padded columns don't perturb the LSE.
    w = weight
    b2 = bias.reshape(1, v)
    if v_pad != v:
        w = jnp.pad(w, ((0, 0), (0, v_pad - v)))
        b2 = jnp.pad(b2, ((0, 0), (0, v_pad - v)), constant_values=_NEG_BIG)

    passes = 1 if single else 2
    loss_shape = (nm, 1, 128)

    if single:
        kernel = _fm_single_kernel
        grid = (nm,)
        in_specs = [
            pl.BlockSpec((tm, h), lambda i: (i, 0)),
            _block_spec((h, v_pad), lambda i: (0, 0), buffered=1),   # grid-invariant W
            _block_spec((1, v_pad), lambda i: (0, 0), buffered=1),   # grid-invariant b
            pl.BlockSpec((tm, 1), lambda i: (i, 0)),
        ]
        out_specs = (
            pl.BlockSpec((tm, v_pad), lambda i: (i, 0)),
            pl.BlockSpec((1, 1, 128), lambda i: (i, 0, 0)),
        )
        scratch_shapes = []
        dim_sem = ("parallel",)
    else:
        kernel = _make_tiled_kernel(nv, tv)
        grid = (nm, 2 * nv)                       # vocab (reduction) axis last
        in_specs = [
            pl.BlockSpec((tm, h), lambda i, k: (i, 0)),
            pl.BlockSpec((h, tv), lambda i, k: (0, jnp.where(k < nv, k, k - nv))),
            pl.BlockSpec((1, tv), lambda i, k: (0, jnp.where(k < nv, k, k - nv))),
            pl.BlockSpec((tm, 1), lambda i, k: (i, 0)),
        ]
        out_specs = (
            # Output block index is held at (i, 0) during the online-LSE sweep (no
            # write, no flush) and only advances during the store sweep, so every
            # logp tile is written back to HBM exactly once with final values.
            pl.BlockSpec((tm, tv), lambda i, k: (i, jnp.where(k < nv, 0, k - nv))),
            pl.BlockSpec((1, 1, 128), lambda i, k: (i, 0, 0)),
        )
        scratch_shapes = [pltpu.VMEM((tm, 1), jnp.float32)] * 3      # m, s, picked
        dim_sem = ("parallel", "arbitrary")

    bytes_accessed = (n_pad * h * x_bytes
                      + nm * passes * h * v_pad * w_bytes
                      + nm * passes * v_pad * b_bytes
                      + n_pad * 4
                      + n_pad * v_pad * out_bytes
                      + nm * 128 * 4)

    outputs, loss_tiles = pl.pallas_call(
        kernel,
        out_shape=(
            jax.ShapeDtypeStruct((n_pad, v_pad), out_dtype),          # log-probs
            jax.ShapeDtypeStruct(loss_shape, jnp.float32),            # per-tile loss
        ),
        grid=grid,
        in_specs=in_specs,
        out_specs=out_specs,
        scratch_shapes=scratch_shapes,
        compiler_params=pltpu.CompilerParams(
            dimension_semantics=dim_sem,
            vmem_limit_bytes=int(budget)),
        cost_estimate=pl.CostEstimate(
            flops=2 * n_pad * h * v_pad * passes,
            transcendentals=n_pad * v_pad,
            bytes_accessed=int(bytes_accessed)),
    )(x, w, b2, tgt2)

    loss = jnp.sum(loss_tiles[:, 0, 0]).reshape(1)
    return loss, outputs[:n, :v]


# ----------------------------------------------------------------------------- reference & test

def _reference(inputs, weight, bias, targets):
    logits = inputs @ weight + bias[None, :]
    logp = jax.nn.log_softmax(logits, axis=-1)
    picked = jnp.take_along_axis(logp, targets[:, None], axis=-1)[:, 0]
    valid = (targets != PAD_INDEX).astype(jnp.float32)
    loss = -jnp.sum(picked * valid)
    return loss.reshape(1), logp


if __name__ == "__main__":
    keys = jax.random.split(jax.random.PRNGKey(0), 8)

    # --- Case 1: toy shapes -> single-V-tile fast path -----------------------
    N, H, V = 8, 32, 128
    x = jax.random.normal(keys[0], (N, H), dtype=jnp.float32)
    w = jax.random.normal(keys[1], (H, V), dtype=jnp.float32) * (1.0 / jnp.sqrt(H))
    b = jax.random.normal(keys[2], (V,), dtype=jnp.float32) * 0.01
    t = jax.random.randint(keys[3], (N,), 0, V, dtype=jnp.int32)
    t = t.at[1].set(PAD_INDEX).at[5].set(PAD_INDEX)   # exercise ignore_index

    loss, out = full_model_forward(x, w, b, t)
    jax.block_until_ready((loss, out))
    ref_loss, ref_out = _reference(x, w, b, t)
    assert loss.shape == (1,) and out.shape == (N, V)
    assert jnp.allclose(out, ref_out, atol=1e-4, rtol=1e-4)
    assert jnp.allclose(loss, ref_loss, atol=1e-3, rtol=1e-4)

    # --- Case 2: force the V-tiled online-logsumexp path (small shapes) ------
    N2, H2, V2 = 32, 32, 384
    x2 = jax.random.normal(keys[4], (N2, H2), dtype=jnp.float32)
    w2 = jax.random.normal(keys[5], (H2, V2), dtype=jnp.float32) * (1.0 / jnp.sqrt(H2))
    b2 = jax.random.normal(keys[6], (V2,), dtype=jnp.float32) * 0.01
    t2 = jax.random.randint(keys[7], (N2,), 0, V2, dtype=jnp.int32)
    t2 = t2.at[0].set(PAD_INDEX).at[17].set(PAD_INDEX)

    loss2, out2 = full_model_forward(x2, w2, b2, t2, tile_override=(16, 128))
    jax.block_until_ready((loss2, out2))
    ref_loss2, ref_out2 = _reference(x2, w2, b2, t2)
    assert out2.shape == (N2, V2)
    assert jnp.allclose(out2, ref_out2, atol=1e-4, rtol=1e-4)
    assert jnp.allclose(loss2, ref_loss2, atol=2e-3, rtol=1e-4)

    print("KERNEL_OK")
</pallas_src>

<mosaic_0001>
module attributes {stable_mosaic.version = 11 : i64} {
  func.func @_fm_single_kernel(%arg0: i32, %arg1: memref<8x32xf32, #tpu.memory_space<vmem>>, %arg2: memref<32x128xf32, #tpu.memory_space<vmem>>, %arg3: memref<1x128xf32, #tpu.memory_space<vmem>>, %arg4: memref<8x1xi32, #tpu.memory_space<vmem>>, %arg5: memref<8x128xf32, #tpu.memory_space<vmem>>, %arg6: memref<1x1x128xf32, #tpu.memory_space<vmem>>) attributes {dimension_semantics = [#tpu.dimension_semantics<parallel>], iteration_bounds = array<i64: 1>, scalar_prefetch = 0 : i64, scratch_operands = 0 : i64, tpu.core_type = #tpu.core_type<tc>, window_params = [{transform_indices = @transform_0, window_bounds = array<i64: 8, 32>}, {pipeline_mode = #tpu.pipeline_mode<synchronous>, transform_indices = @transform_1, window_bounds = array<i64: 32, 128>}, {pipeline_mode = #tpu.pipeline_mode<synchronous>, transform_indices = @transform_2, window_bounds = array<i64: 1, 128>}, {transform_indices = @transform_3, window_bounds = array<i64: 8, 1>}, {transform_indices = @transform_4, window_bounds = array<i64: 8, 128>}, {transform_indices = @transform_5, window_bounds = array<i64: 1, 1, 128>}]} {
    %c0 = arith.constant 0 : index
    %c0_0 = arith.constant 0 : index
    %0 = vector.load %arg1[%c0, %c0_0] : memref<8x32xf32, #tpu.memory_space<vmem>>, vector<8x32xf32>
    %c0_1 = arith.constant 0 : index
    %c0_2 = arith.constant 0 : index
    %1 = vector.load %arg2[%c0_1, %c0_2] : memref<32x128xf32, #tpu.memory_space<vmem>>, vector<32x128xf32>
    %cst = arith.constant dense<0.000000e+00> : vector<8x128xf32>
    %2 = tpu.matmul %0, %1, %cst {dimension_numbers = #tpu.dot_dimension_numbers<[1], [0], [0], [1], [0, 0, 1, 1], [], []>} : vector<8x32xf32>, vector<32x128xf32>, vector<8x128xf32> -> vector<8x128xf32>
    %c0_3 = arith.constant 0 : index
    %c0_4 = arith.constant 0 : index
    %3 = vector.load %arg3[%c0_3, %c0_4] : memref<1x128xf32, #tpu.memory_space<vmem>>, vector<1x128xf32>
    %4 = vector.broadcast %3 : vector<1x128xf32> to vector<8x128xf32>
    %5 = arith.addf %2, %4 : vector<8x128xf32>
    %cst_5 = arith.constant dense<0xFF800000> : vector<8xf32>
    %6 = vector.multi_reduction <maximumf>, %5, %cst_5 [1] : vector<8x128xf32> to vector<8xf32>
    %7 = vector.shape_cast %6 : vector<8xf32> to vector<8x1xf32>
    %8 = vector.broadcast %7 : vector<8x1xf32> to vector<8x128xf32>
    %9 = arith.subf %5, %8 : vector<8x128xf32>
    %10 = math.exp %9 : vector<8x128xf32>
    %cst_6 = arith.constant dense<0.000000e+00> : vector<8xf32>
    %11 = vector.multi_reduction <add>, %10, %cst_6 [1] : vector<8x128xf32> to vector<8xf32>
    %12 = vector.shape_cast %11 : vector<8xf32> to vector<8x1xf32>
    %13 = math.log %12 : vector<8x1xf32>
    %14 = arith.addf %7, %13 : vector<8x1xf32>
    %15 = vector.broadcast %14 : vector<8x1xf32> to vector<8x128xf32>
    %16 = arith.subf %5, %15 : vector<8x128xf32>
    %c0_7 = arith.constant 0 : index
    %c0_8 = arith.constant 0 : index
    %17 = vector.load %arg5[%c0_7, %c0_8] : memref<8x128xf32, #tpu.memory_space<vmem>>, vector<8x128xf32>
    tpu.vector_store %arg5[%c0_7, %c0_8], %16 {strides = array<i32>} : memref<8x128xf32, #tpu.memory_space<vmem>>, vector<8x128xf32>,
    %c0_9 = arith.constant 0 : index
    %c0_10 = arith.constant 0 : index
    %18 = vector.load %arg4[%c0_9, %c0_10] : memref<8x1xi32, #tpu.memory_space<vmem>>, vector<8x1xi32>
    %19 = tpu.iota {dimensions = array<i32: 1>} : vector<8x128xi32>
    %20 = vector.broadcast %18 : vector<8x1xi32> to vector<8x128xi32>
    %21 = arith.cmpi eq, %19, %20 : vector<8x128xi32>
    %cst_11 = arith.constant 0.000000e+00 : f32
    %22 = vector.broadcast %cst_11 : f32 to vector<8x128xf32>
    %23 = arith.select %21, %16, %22 : vector<8x128xi1>, vector<8x128xf32>
    %cst_12 = arith.constant dense<0.000000e+00> : vector<8xf32>
    %24 = vector.multi_reduction <add>, %23, %cst_12 [1] : vector<8x128xf32> to vector<8xf32>
    %25 = vector.shape_cast %24 : vector<8xf32> to vector<8x1xf32>
    %c0_i32 = arith.constant 0 : i32
    %26 = vector.broadcast %c0_i32 : i32 to vector<8x1xi32>
    %27 = arith.cmpi ne, %18, %26 : vector<8x1xi32>
    %28 = arith.extui %27 : vector<8x1xi1> to vector<8x1xi32>
    %29 = arith.sitofp %28 : vector<8x1xi32> to vector<8x1xf32>
    %cst_13 = arith.constant 0.000000e+00 : f32
    %30 = vector.broadcast %cst_13 : f32 to vector<8x1xf32>
    %31 = arith.subf %30, %29 : vector<8x1xf32>
    %32 = arith.mulf %31, %25 : vector<8x1xf32>
    %33 = vector.shape_cast %32 : vector<8x1xf32> to vector<1x8x1xf32>
    %cst_14 = arith.constant dense<0.000000e+00> : vector<1xf32>
    %34 = vector.multi_reduction <add>, %33, %cst_14 [1, 2] : vector<1x8x1xf32> to vector<1xf32>
    %35 = vector.shape_cast %34 : vector<1xf32> to vector<1x1x1xf32>
    %36 = vector.extract %35[0, 0, 0] : f32 from vector<1x1x1xf32>
    %37 = vector.broadcast %36 : f32 to vector<1x1x128xf32>
    %c0_15 = arith.constant 0 : index
    %c0_16 = arith.constant 0 : index
    %c0_17 = arith.constant 0 : index
    %38 = vector.load %arg6[%c0_15, %c0_16, %c0_17] : memref<1x1x128xf32, #tpu.memory_space<vmem>>, vector<1x1x128xf32>
    tpu.vector_store %arg6[%c0_15, %c0_16, %c0_17], %37 {strides = array<i32>} : memref<1x1x128xf32, #tpu.memory_space<vmem>>, vector<1x1x128xf32>,
    return
  }
  func.func @transform_0(%arg0: i32) -> (i32, i32) {
    %c0_i32 = arith.constant 0 : i32
    %c0_i32_0 = arith.constant 0 : i32
    return %arg0, %c0_i32 : i32, i32
  }
  func.func @transform_1(%arg0: i32) -> (i32, i32) {
    %c0_i32 = arith.constant 0 : i32
    %c0_i32_0 = arith.constant 0 : i32
    %c0_i32_1 = arith.constant 0 : i32
    return %c0_i32, %c0_i32_0 : i32, i32
  }
  func.func @transform_2(%arg0: i32) -> (i32, i32) {
    %c0_i32 = arith.constant 0 : i32
    %c0_i32_0 = arith.constant 0 : i32
    %c0_i32_1 = arith.constant 0 : i32
    return %c0_i32, %c0_i32_0 : i32, i32
  }
  func.func @transform_3(%arg0: i32) -> (i32, i32) {
    %c0_i32 = arith.constant 0 : i32
    %c0_i32_0 = arith.constant 0 : i32
    return %arg0, %c0_i32 : i32, i32
  }
  func.func @transform_4(%arg0: i32) -> (i32, i32) {
    %c0_i32 = arith.constant 0 : i32
    %c0_i32_0 = arith.constant 0 : i32
    return %arg0, %c0_i32 : i32, i32
  }
  func.func @transform_5(%arg0: i32) -> (i32, i32, i32) {
    %c0_i32 = arith.constant 0 : i32
    %c0_i32_0 = arith.constant 0 : i32
    %c0_i32_1 = arith.constant 0 : i32
    return %arg0, %c0_i32, %c0_i32_0 : i32, i32, i32
  }
}

</mosaic_0001>

<bundles_post_ra>
// kernel: tpu_custom_call.1
= control target key start
LH: loop header
LB: loop body
LE: loop exit
PB: predicated region body
PF: predicated region fallthrough
CT: control target
= control target key end

     0   :  { %11 = vsyncpa [#allocation3], 0  ;;  %s388_s0 = inlined_call_operand.vmem [shape: f32[8,32], index: 0, kind: input, shape index: {}]   ;;  %s389_s1 = inlined_call_operand.hbm [shape: f32[32,128], index: 1, kind: input, shape index: {}]   ;;  %s390_s2 = inlined_call_operand.vmem [shape: f32[1,128], index: 2, kind: input, shape index: {}]   ;;  %s391_s3 = inlined_call_operand.vmem [shape: s32[8,1], index: 3, kind: input, shape index: {}]   ;;  %s392_s4 = inlined_call_operand.hbm [shape: f32[8,128], index: 4, kind: output, shape index: {0}]   ;;  %s393_s5 = inlined_call_operand.hbm [shape: f32[1,1,128], index: 5, kind: output, shape index: {1}]  }
   0x1   :  { %12 = vsyncpa [#allocation4], 0 }
   0x2   :  { %13 = vsyncpa [#allocation7], 0  ;;  %s304_s18 = smov [#allocation2]   ;;  %s232_s22 = scalar_lea.hbm %s389_s1, 512 }
   0x3   :  { %s21_s19 = sshll.u32 %s304_s18, 4  ;;  %p233_p0 = scmp.ne.s32.totalorder %s389_s1, %s232_s22  ;;  %s22_s19 = int_to_ptr.vmem [resolvable:$true] %s21_s19 }
   0x4   :  { %p236_p1 = scmp.lt.u32.totalorder %s232_s22, %s389_s1 }
   0x6   :  { %p238_p2 = pnand %p236_p1, %p233_p0 }
   0x8   :  { %241 = shalt.err (!%p238_p2)
}
   0x9   :  { %s242_s27 = scalar_lea.vmem %s22_s19, 512  ;;  %p247_p4 = scmp.lt.s32.totalorder %s22_s19, %s22_s19 }
   0xa   :  { %p243_p3 = scmp.ne.s32.totalorder %s22_s19, %s242_s27  ;;  %p248_p5 = scmp.lt.s32.totalorder %s242_s27, %s242_s27 }
   0xc   :  { %p249_p6 = por %p248_p5, %p247_p4 }
   0xe   :  { %p250_p7 = pnand %p249_p6, %p243_p3 }
  0x10   :  { %253 = shalt.err (!%p250_p7)
}
  0x11   :  { %s305_s28 = smov 128   ;;  %s306_s29 = smov 8  }
  0x12   :  { %27 = dma.hbm_to_vmem [thread:$0]  %s389_s1, 512, %s22_s19, [#allocation3], %s305_s28, %s305_s28, %s306_s29  }
  0x13   :  { %298 = dma.done.wait [#allocation3], 512  }
  0x14   :  { %299 = vsyncadd [#allocation3], 4294966784  ;;  %v307_v0 = vmov 0.0|0.0   ;;  %vm308_vm0 = vmmov 0   ;;  %v309_v1 = vmov 0.0   ;;  %v36_v2 = vld [vmem:[#allocation2] sm:$0xff]  ;;  %v134_v20 = vlaneseq }
  0x15   :  { %209 = vmatprep.subr.bf16.mxu0 %v307_v0  ;;  %206 = vmatprep.mubr.msk.f32.mxu0 %vm308_vm0, %v309_v1  ;;  %v37_v3 = vld [vmem:[#allocation2 + $0x8] sm:$0xff]  ;;  %v38_v4 = vld [vmem:[#allocation2 + $0x10] sm:$0xff]  ;;  %v39_v6 = vld [vmem:[#allocation2 + $0x18] sm:$0xff]  ;;  %vm47_vm1 = vcmask 261120   ;;  %v310_v14 = vmov 0   ;;  %vm148_vm4 = vcmask 7168  }
  0x16   :  { %v210_v5 = vpack.c.bf16 %v37_v3, %v36_v2  ;;  %v213_v7 = vpack.c.bf16 %v39_v6, %v38_v4  ;;  %v35_v8 = vld [vmem:[%s388_s0] sm:$0xff]  ;;  %226 = vset.pattern.permute.xlu1 %v310_v14  ;;  %227 = vset.pattern.permute.xlu0 %v310_v14  ;;  %v135_v22 = vand.u32 127, %v134_v20  ;;  %s311_s0 = smov [#allocation5]  }
  0x17   :  { %v190_v9 = vld [vmem:[%s390_s2] ss:$0 sm:$0xff]  ;;  %s167_s2 = sshll.u32 %s311_s0, 4  ;;  %s168_s2 = int_to_ptr.vmem [resolvable:$true] %s167_s2 }
  0x18   :  { %211 = vmatpush3.bf16.msra.mxu0 %v210_v5  ;;  %v133_v13 = vld [vmem:[%s391_s3] sm:$0xff]  ;;  %s254_s3 = scalar_lea.vmem %s168_s2, 128  ;;  %p259_p9 = scmp.lt.s32.totalorder %s168_s2, %s168_s2 }
  0x19   :  { %212 = vmatprep.subr.bf16.mxu0 %v307_v0  ;;  %137 = vperm.xlu1 %226, %v133_v13   ;;  %vm143_vm3 = vcmp.ne.s32.totalorder %v133_v13, 0  ;;  %p255_p8 = scmp.ne.s32.totalorder %s168_s2, %s254_s3  ;;  %p260_p10 = scmp.lt.s32.totalorder %s254_s3, %s254_s3 }
  0x1a   :  { %v192_v28 = vsel %vm143_vm3, 1.0, %v309_v1 }
  0x1b   :  { %v146_v29 = vsub.f32 0.0, %v192_v28  ;;  %p261_p11 = por %p260_p10, %p259_p9 }
  0x1c   :  { %214 = vmatpush3.bf16.msra.mxu0 %v213_v7 }
  0x1d   :  { %p262_p12 = pnand %p261_p11, %p255_p8 }
  0x1f   :  { %207 = vmatmul.mubr.msk.f32.vlgmr.msra.gmra.mrb[0].mxu0 %vm47_vm1, %v35_v8 }
  0x98   :  { %v138_v24 = vpop.permute.xlu1 %137 }
  0x99   :  { %vm139_vm2 = vcmp.eq.s32.totalorder %v135_v22, %v138_v24 }
  0xf2   :  { %v117_v10 = vpop.f32.mrb[0].mxu0 }
  0xf3   :  { %v118_v11 = vadd.f32 %v190_v9, %v117_v10  ;;  %v208_v12 = vpop.f32.mrb[1].mxu0 }
  0xf5   :  { %121 = vmax.xlane.f32.xlu0 %v118_v11 }
 0x182   :  { %v122_v15 = vpop.xlane.xlu0 %121 }
 0x183   :  { %v123_v16 = vsub.f32 %v118_v11, %v122_v15 }
 0x185   :  { %v124_v17 = vmul.f32 1.442695, %v123_v16 }
 0x187   :  { %228 = vpow2.f32 %v124_v17 }
 0x191   :  { %v229_v18 = vpop.eup %228 }
 0x192   :  { %126 = vadd.xlane.f32.xlu0 %v229_v18 }
 0x21f   :  { %v127_v19 = vpop.xlane.xlu0 %126 }
 0x220   :  { %230 = vlog2.f32 %v127_v19 }
 0x22a   :  { %v231_v21 = vpop.eup %230 }
 0x22b   :  { %v129_v23 = vmul.f32 0.6931472, %v231_v21 }
 0x22d   :  { %v130_v25 = vadd.f32 %v129_v23, %v122_v15 }
 0x22f   :  { %v131_v26 = vsub.f32 %v118_v11, %v130_v25 }
 0x231   :  { %v140_v27 = vsel %vm139_vm2, %v131_v26, 0.0  ;;  %132 = vst [vmem:[#allocation5] sm:$0xff] %v131_v26 }
 0x232   :  { %141 = vadd.xlane.f32.xlu1 %v140_v27 }
 0x2bf   :  { %v142_v30 = vpop.xlane.xlu1 %141 }
 0x2c0   :  { %v147_v31 = vmul.f32 %v146_v29, %v142_v30 }
 0x2c2   :  { %v149_v32 = vsel %vm148_vm4, %v147_v31, 0.0 }
 0x2c3   :  { %150 = vadd.xlane.f32.xlu0 %v149_v32 }
 0x2c4   :  { %265 = shalt.err (!%p262_p12)
}
 0x2c5   :  { %s266_s14 = scalar_lea.hbm %s392_s4, 128 }
 0x2c6   :  { %p267_p13 = scmp.ne.s32.totalorder %s392_s4, %s266_s14  ;;  %p270_p0 = scmp.lt.u32.totalorder %s266_s14, %s392_s4 }
 0x2c8   :  { %p272_p1 = pnand %p270_p0, %p267_p13 }
 0x2ca   :  { %275 = shalt.err (!%p272_p1)
}
 0x2cb   :  { %170 = dma.vmem_to_hbm [thread:$0]  %s168_s2, 128, %s392_s4, [#allocation4]  }
 0x2cc   :  { %s312_s21 = smov [#allocation6]  }
 0x2cd   :  { %s177_s22 = sshll.u32 %s312_s21, 4  ;;  %s178_s22 = int_to_ptr.vmem [resolvable:$true] %s177_s22 }
 0x2ce   :  { %s276_s24 = scalar_lea.vmem %s178_s22, 16  ;;  %s280_s25 = scalar_lea.vmem %s178_s22, 32 }
 0x2cf   :  { %p277_p2 = scmp.ne.s32.totalorder %s178_s22, %s276_s24  ;;  %p281_p3 = scmp.lt.s32.totalorder %s178_s22, %s178_s22 }
 0x2d0   :  { %p282_p4 = scmp.lt.s32.totalorder %s280_s25, %s276_s24 }
 0x2d2   :  { %p283_p5 = por %p282_p4, %p281_p3 }
 0x2d4   :  { %p284_p6 = pnand %p283_p5, %p277_p2 }
 0x350   :  { %v151_v33 = vpop.xlane.xlu0 %150 }
 0x351   :  { %v152_v34 = vrot.slane %v151_v33, 4 }
 0x353   :  { %v153_v35 = vadd.f32 %v152_v34, %v151_v33 }
 0x355   :  { %v154_v36 = vrot.slane %v153_v35, 2 }
 0x357   :  { %v155_v37 = vadd.f32 %v154_v36, %v153_v35 }
 0x359   :  { %v156_v38 = vrot.slane %v155_v37, 1 }
 0x35b   :  { %v157_v39 = vadd.f32 %v156_v38, %v155_v37 }
 0x35d   :  { %215 = vpush %v157_v39 }
 0x38e   :  { %s216_s23 = spop %215 }
 0x38f   :  { %v159_v40 = vstv %s216_s23 }
 0x390   :  { %160 = vst [vmem:[#allocation6] sm:$0x1] %v159_v40 }
 0x391   :  { %287 = shalt.err (!%p284_p6)
}
 0x392   :  { %s288_s27 = scalar_lea.hbm %s393_s5, 16 }
 0x393   :  { %p289_p7 = scmp.ne.s32.totalorder %s393_s5, %s288_s27  ;;  %p292_p8 = scmp.lt.u32.totalorder %s288_s27, %s393_s5 }
 0x395   :  { %p294_p9 = pnand %p292_p8, %p289_p7 }
 0x397   :  { %297 = shalt.err (!%p294_p9)
}
 0x398   :  { %180 = dma.vmem_to_hbm [thread:$0]  %s178_s22, 16, %s393_s5, [#allocation7]  }
 0x399   :  { %300 = dma.done.wait [#allocation4], 128  }
 0x39a   :  { %301 = vsyncadd [#allocation4], 4294967168 }
 0x39b   :  { %302 = dma.done.wait [#allocation7], 16  }
 0x39c   :  { %303 = vsyncadd [#allocation7], 4294967280 }
 0x39d   :  { %187 = vsyncpa [#allocation3], 1 }
 0x39e   :  { %188 = vsyncpa [#allocation4], 1 }
 0x39f   :  { %189 = vsyncpa [#allocation7], 1 }

</bundles_post_ra>
